<compile_context>
chip_gen: v7x
topology: tpu7x:2x2x1
jax: 0.10.0
libtpu: 0.0.40
codegen_flags: <defaults>
</compile_context>

<pallas_src>
import jax
import jax.numpy as jnp
from jax.experimental import pallas as pl
from jax.experimental.pallas import tpu as pltpu


def binnn_kernel(x_ref, w1_ref, b1_ref, w2_ref, b2_ref, o_ref):
    # ---- Layer 1 (MXU) : hidden = x @ W1 + b1 -------------------------------
    h = jnp.dot(x_ref[...], w1_ref[...], preferred_element_type=jnp.float32)
    h = h + b1_ref[...]                      # (TB, H) + (1, H) broadcast (VPU)
    a = jnp.maximum(h, 0.0)                  # ReLU (VPU)

    # ---- Layer 2 (VPU mul + XLU lane-reduce) : z = a @ w2 + b2 --------------
    # w2 is a pre-transposed (1, H) row; an MXU matmul with N=1 would waste a
    # whole systolic pass to fill a single lane column.
    # (If a bundle dump shows a visible vxpose between this reduce and the
    #  (1, TB) store, a lax.dot_general producing (1, TB) directly is the
    #  alternative — keep whichever is cheaper on the measured dump.)
    z = jnp.sum(a * w2_ref[...], axis=-1)    # (TB,)  reduce over H
    z = z + b2_ref[0]                        # scalar bias from SMEM

    # ---- Sigmoid (EUP) + lane-dense store ------------------------------------
    # Result laid out as (1, TB): batch on lanes -> unmasked vector stores.
    o_ref[...] = jax.nn.sigmoid(z)[None, :].astype(o_ref.dtype)


_V7X_SAFE_VMEM = 64 * 1024 * 1024   # per-TensorCore physical VMEM on v7x


def _round_up(n, m):
    return -(-n // m) * m


def _vmem_bytes(tb, d_in, h):
    # f32 footprint of one pipeline configuration (sublane-padded where relevant):
    #   x    : double-buffered streaming input           2 * TB * D_in
    #   W1   : resident, single-buffered (Buffered(1))   D_in * H
    #   b1 + w2 row : resident, single-buffered          2 * 8 * H   (sublane pad)
    #   out  : (1, TB) row, double-buffered              2 * 8 * TB  (sublane pad)
    return 4 * (2 * tb * d_in + d_in * h + 2 * 8 * h + 2 * 8 * tb)


def _choose_batch_tile(batch, d_in, h):
    b128 = _round_up(batch, 128)
    # Small D_in -> x stream is HBM / per-step-overhead bound -> prefer big batch
    # tiles (measured roofline fraction on v6e: 29% @128, 85% @512, 86% @1024).
    candidates = (2048, 1024, 512, 256, 128) if d_in <= 512 else (1024, 512, 256, 128)
    # Prefer >= 2 grid steps (pipelining; core sharding on v7x's 2 TensorCores).
    target = b128 // 2 if b128 >= 256 else b128
    tb = 128
    for c in candidates:
        if c <= target and _vmem_bytes(c, d_in, h) <= _V7X_SAFE_VMEM - (8 << 20):
            tb = c
            break
    return tb, _round_up(batch, tb)


def binnn_forward(x, w1, b1, w2, b2):
    B, D_in = x.shape
    H = w1.shape[1]
    TB, B_pad = _choose_batch_tile(B, D_in, H)
    grid = (B_pad // TB,)

    # TODO(synk): add a K (D_in) / N (H) weight-tiling path with an f32 VMEM
    # accumulator + pl.when epilogue for models whose resident f32 W1 exceeds
    # v7x's 64 MiB per-core VMEM (roughly D_in*H*4 > ~32 MiB); not needed here.

    x32 = x.astype(jnp.float32)
    if B_pad != B:
        # Pad batch to a multiple of TB: keeps unmasked lane-dense stores and a
        # pipelined grid instead of one oversized, masked full-batch block.
        x32 = jnp.pad(x32, ((0, B_pad - B), (0, 0)))

    w1_f = w1.astype(jnp.float32)
    b1_row = b1.reshape(1, H).astype(jnp.float32)
    w2_row = w2.reshape(1, H).astype(jnp.float32)   # (H, 1) -> (1, H) row
    b2_s = b2.reshape(1).astype(jnp.float32)        # scalar for SMEM

    cost = pl.CostEstimate(
        flops=2 * B_pad * D_in * H + 2 * B_pad * H,
        transcendentals=2 * B_pad,   # sigmoid ~ exp + reciprocal per element
        bytes_accessed=4 * (B_pad * D_in + D_in * H + 2 * H + 1 + B_pad),
    )

    # Explicit scoped-VMEM budget: never below the 32 MiB default, never above
    # v7x's 64 MiB per-core physical VMEM (raise the cap on v5e/v6e's 128 MiB
    # parts if a much larger resident W1 is ever needed).
    vmem_limit = int(min(_V7X_SAFE_VMEM, max(32 << 20, 2 * _vmem_bytes(TB, D_in, H))))

    out_row = pl.pallas_call(
        binnn_kernel,
        out_shape=jax.ShapeDtypeStruct((1, B_pad), jnp.float32),
        grid=grid,
        in_specs=[
            # x: streamed over the batch grid axis (default double-buffering).
            pl.BlockSpec((TB, D_in), lambda i: (i, 0)),
            # W1 / b1 / w2 row: constant block index -> VMEM-resident across all
            # batch tiles; a second pipeline buffer would be pure VMEM waste.
            pl.BlockSpec((D_in, H), lambda i: (0, 0), pipeline_mode=pl.Buffered(1)),
            pl.BlockSpec((1, H), lambda i: (0, 0), pipeline_mode=pl.Buffered(1)),
            pl.BlockSpec((1, H), lambda i: (0, 0), pipeline_mode=pl.Buffered(1)),
            # b2: single scalar in SMEM (no padded VMEM tile, no DMA churn).
            pl.BlockSpec(memory_space=pltpu.MemorySpace.SMEM),
        ],
        # Lane-dense output: (1, TB) row per grid step, batch along lanes.
        out_specs=pl.BlockSpec((1, TB), lambda i: (0, i)),
        compiler_params=pltpu.CompilerParams(
            # Batch tiles are independent -> shard across cores (v7x: 2 TCs).
            dimension_semantics=("parallel",),
            vmem_limit_bytes=vmem_limit,
        ),
        cost_estimate=cost,
    )(x32, w1_f, b1_row, w2_row, b2_s)

    # (1, B_pad) lane-dense row -> drop padding -> (B, 1) nn.Linear convention.
    return out_row[:, :B].reshape(B, 1)


def init_params(key, input_size, hidden_size):
    # Deterministic init mimicking nn.Linear default: U(-1/sqrt(fan_in), +1/sqrt(fan_in))
    k1, k2, k3, k4 = jax.random.split(key, 4)
    bound1 = 1.0 / jnp.sqrt(input_size)
    bound2 = 1.0 / jnp.sqrt(hidden_size)
    w1 = jax.random.uniform(k1, (input_size, hidden_size), jnp.float32, -bound1, bound1)
    b1 = jax.random.uniform(k2, (1, hidden_size), jnp.float32, -bound1, bound1)
    w2 = jax.random.uniform(k3, (hidden_size, 1), jnp.float32, -bound2, bound2)
    b2 = jax.random.uniform(k4, (1, 1), jnp.float32, -bound2, bound2)
    return w1, b1, w2, b2


if __name__ == "__main__":
    # num_classes from the PyTorch ctor is unused: the binary head has 1 output.
    batch, input_size, hidden_size = 8, 32, 32

    key = jax.random.PRNGKey(0)
    kx, kp = jax.random.split(key)
    x = jax.random.normal(kx, (batch, input_size), jnp.float32)
    w1, b1, w2, b2 = init_params(kp, input_size, hidden_size)

    y = jax.block_until_ready(binnn_forward(x, w1, b1, w2, b2))

    # Reference check in plain JAX (same forward semantics as the PyTorch module).
    ref = jax.nn.sigmoid(jnp.maximum(x @ w1 + b1, 0.0) @ w2 + b2)
    assert y.shape == (batch, 1)
    assert jnp.allclose(y, ref, atol=1e-5, rtol=1e-5), float(jnp.max(jnp.abs(y - ref)))

    print("KERNEL_OK")
</pallas_src>

<mosaic_0001>
module attributes {stable_mosaic.version = 11 : i64} {
  func.func @binnn_kernel(%arg0: i32, %arg1: memref<128x32xf32, #tpu.memory_space<vmem>>, %arg2: memref<32x32xf32, #tpu.memory_space<vmem>>, %arg3: memref<1x32xf32, #tpu.memory_space<vmem>>, %arg4: memref<1x32xf32, #tpu.memory_space<vmem>>, %arg5: memref<1xf32, #tpu.memory_space<smem>>, %arg6: memref<1x128xf32, #tpu.memory_space<vmem>>) attributes {dimension_semantics = [#tpu.dimension_semantics<parallel>], iteration_bounds = array<i64: 1>, scalar_prefetch = 0 : i64, scratch_operands = 0 : i64, tpu.core_type = #tpu.core_type<tc>, window_params = [{transform_indices = @transform_0, window_bounds = array<i64: 128, 32>}, {pipeline_mode = #tpu.pipeline_mode<synchronous>, transform_indices = @transform_1, window_bounds = array<i64: 32, 32>}, {pipeline_mode = #tpu.pipeline_mode<synchronous>, transform_indices = @transform_2, window_bounds = array<i64: 1, 32>}, {pipeline_mode = #tpu.pipeline_mode<synchronous>, transform_indices = @transform_3, window_bounds = array<i64: 1, 32>}, {transform_indices = @transform_4, window_bounds = array<i64: 1>}, {transform_indices = @transform_5, window_bounds = array<i64: 1, 128>}]} {
    %c0 = arith.constant 0 : index
    %c0_0 = arith.constant 0 : index
    %0 = vector.load %arg1[%c0, %c0_0] : memref<128x32xf32, #tpu.memory_space<vmem>>, vector<128x32xf32>
    %c0_1 = arith.constant 0 : index
    %c0_2 = arith.constant 0 : index
    %1 = vector.load %arg2[%c0_1, %c0_2] : memref<32x32xf32, #tpu.memory_space<vmem>>, vector<32x32xf32>
    %cst = arith.constant dense<0.000000e+00> : vector<128x32xf32>
    %2 = tpu.matmul %0, %1, %cst {dimension_numbers = #tpu.dot_dimension_numbers<[1], [0], [0], [1], [0, 0, 1, 1], [], []>} : vector<128x32xf32>, vector<32x32xf32>, vector<128x32xf32> -> vector<128x32xf32>
    %c0_3 = arith.constant 0 : index
    %c0_4 = arith.constant 0 : index
    %3 = vector.load %arg3[%c0_3, %c0_4] : memref<1x32xf32, #tpu.memory_space<vmem>>, vector<1x32xf32>
    %4 = vector.broadcast %3 : vector<1x32xf32> to vector<128x32xf32>
    %5 = arith.addf %2, %4 : vector<128x32xf32>
    %cst_5 = arith.constant 0.000000e+00 : f32
    %6 = vector.broadcast %cst_5 : f32 to vector<128x32xf32>
    %7 = arith.maximumf %5, %6 : vector<128x32xf32>
    %c0_6 = arith.constant 0 : index
    %c0_7 = arith.constant 0 : index
    %8 = vector.load %arg4[%c0_6, %c0_7] : memref<1x32xf32, #tpu.memory_space<vmem>>, vector<1x32xf32>
    %9 = vector.broadcast %8 : vector<1x32xf32> to vector<128x32xf32>
    %10 = arith.mulf %7, %9 : vector<128x32xf32>
    %cst_8 = arith.constant dense<0.000000e+00> : vector<128xf32>
    %11 = vector.multi_reduction <add>, %10, %cst_8 [1] : vector<128x32xf32> to vector<128xf32>
    %c0_9 = arith.constant 0 : index
    %12 = memref.load %arg5[%c0_9] : memref<1xf32, #tpu.memory_space<smem>>
    %13 = vector.broadcast %12 : f32 to vector<128xf32>
    %14 = arith.addf %11, %13 : vector<128xf32>
    %15 = arith.negf %14 : vector<128xf32>
    %16 = math.exp %15 : vector<128xf32>
    %cst_10 = arith.constant 1.000000e+00 : f32
    %17 = vector.broadcast %cst_10 : f32 to vector<128xf32>
    %18 = arith.addf %17, %16 : vector<128xf32>
    %19 = arith.divf %17, %18 : vector<128xf32>
    %20 = vector.shape_cast %19 : vector<128xf32> to vector<1x128xf32>
    %c0_11 = arith.constant 0 : index
    %c0_12 = arith.constant 0 : index
    %21 = vector.load %arg6[%c0_11, %c0_12] : memref<1x128xf32, #tpu.memory_space<vmem>>, vector<1x128xf32>
    tpu.vector_store %arg6[%c0_11, %c0_12], %20 {strides = array<i32>} : memref<1x128xf32, #tpu.memory_space<vmem>>, vector<1x128xf32>,
    return
  }
  func.func @transform_0(%arg0: i32) -> (i32, i32) {
    %c0_i32 = arith.constant 0 : i32
    %c0_i32_0 = arith.constant 0 : i32
    return %arg0, %c0_i32 : i32, i32
  }
  func.func @transform_1(%arg0: i32) -> (i32, i32) {
    %c0_i32 = arith.constant 0 : i32
    %c0_i32_0 = arith.constant 0 : i32
    %c0_i32_1 = arith.constant 0 : i32
    return %c0_i32, %c0_i32_0 : i32, i32
  }
  func.func @transform_2(%arg0: i32) -> (i32, i32) {
    %c0_i32 = arith.constant 0 : i32
    %c0_i32_0 = arith.constant 0 : i32
    %c0_i32_1 = arith.constant 0 : i32
    return %c0_i32, %c0_i32_0 : i32, i32
  }
  func.func @transform_3(%arg0: i32) -> (i32, i32) {
    %c0_i32 = arith.constant 0 : i32
    %c0_i32_0 = arith.constant 0 : i32
    %c0_i32_1 = arith.constant 0 : i32
    return %c0_i32, %c0_i32_0 : i32, i32
  }
  func.func @transform_4(%arg0: i32) -> i32 {
    %c0_i32 = arith.constant 0 : i32
    %c0_i32_0 = arith.constant 0 : i32
    return %c0_i32 : i32
  }
  func.func @transform_5(%arg0: i32) -> (i32, i32) {
    %c0_i32 = arith.constant 0 : i32
    %c0_i32_0 = arith.constant 0 : i32
    return %c0_i32, %arg0 : i32, i32
  }
}

</mosaic_0001>

<bundles_post_ra>
// kernel: tpu_custom_call.1
= control target key start
LH: loop header
LB: loop body
LE: loop exit
PB: predicated region body
PF: predicated region fallthrough
CT: control target
= control target key end

     0   :  { %vm49_vm0 = vcmask 261120   ;;  %s1012_s0 = inlined_call_operand.vmem [shape: f32[128,32], index: 0, kind: input, shape index: {}]   ;;  %s1013_s1 = inlined_call_operand.vmem [shape: f32[32,32], index: 1, kind: input, shape index: {}]   ;;  %s1014_s2 = inlined_call_operand.vmem [shape: f32[1,32], index: 2, kind: input, shape index: {}]   ;;  %s1015_s3 = inlined_call_operand.vmem [shape: f32[1,32], index: 3, kind: input, shape index: {}]   ;;  %s1016_s4 = inlined_call_operand.<no memory space> [shape: f32[1], index: 4, kind: input, shape index: {}]   ;;  %s1017_s5 = inlined_call_operand.hbm [shape: f32[1,128], index: 5, kind: output, shape index: {}]  }
   0x1   :  { %v38_v0 = vld [vmem:[%s1013_s1] sm:$0xff]  ;;  %v39_v1 = vld [vmem:[%s1013_s1 + $0x8] sm:$0xff]  ;;  %v40_v2 = vld [vmem:[%s1013_s1 + $0x10] sm:$0xff] }
   0x2   :  { %v673_v3 = vpack.c.bf16 %v39_v1, %v38_v0  ;;  %v41_v4 = vld [vmem:[%s1013_s1 + $0x18] sm:$0xff]  ;;  %v22_v5 = vld [vmem:[%s1012_s0] sm:$0xff] }
   0x3   :  { %v30_v6 = vld [vmem:[%s1012_s0 + $0x40] sm:$0xff]  ;;  %v677_v7 = vpack.c.bf16 %v41_v4, %v40_v2  ;;  %649 = vmatprep.mubr.msk.f32.mxu0 %vm49_vm0, %v22_v5 }
   0x4   :  { %661 = vmatprep.mubr.msk.f32.mxu1 %vm49_vm0, %v30_v6  ;;  %674 = vmatprep.subr.bf16.mxu0 %v673_v3 }
   0x5   :  { %681 = vmatprep.subr.bf16.mxu1 %v673_v3  ;;  %676 = vmatpush3.bf16.msra.mxu0 %v673_v3 }
   0x6   :  { %683 = vmatpush3.bf16.msra.mxu1 %v673_v3  ;;  %678 = vmatprep.subr.bf16.mxu0 %v677_v7 }
   0x7   :  { %682 = vmatprep.subr.bf16.mxu1 %v677_v7 }
   0x8   :  { %11 = vsyncpa [#allocation4], 0  ;;  %v23_v8 = vld [vmem:[%s1012_s0 + $0x8] sm:$0xff]  ;;  %v24_v10 = vld [vmem:[%s1012_s0 + $0x10] sm:$0xff]  ;;  %vm471_vm1 = vcmask 130112   ;;  %vm478_vm2 = vcmask 195712  }
   0x9   :  { %680 = vmatpush3.bf16.msra.mxu0 %v677_v7  ;;  %v31_v9 = vld [vmem:[%s1012_s0 + $0x48] sm:$0xff]  ;;  %v32_v11 = vld [vmem:[%s1012_s0 + $0x50] sm:$0xff]  ;;  %v25_v12 = vld [vmem:[%s1012_s0 + $0x18] sm:$0xff]  ;;  %vm485_vm3 = vcmask 261312   ;;  %vm492_vm4 = vcmask 326912   ;;  %vm499_vm5 = vcmask 392512  }
   0xa   :  { %684 = vmatpush3.bf16.msra.mxu1 %v677_v7  ;;  %v33_v13 = vld [vmem:[%s1012_s0 + $0x58] sm:$0xff]  ;;  %v26_v14 = vld [vmem:[%s1012_s0 + $0x20] sm:$0xff]  ;;  %v27_v16 = vld [vmem:[%s1012_s0 + $0x28] sm:$0xff]  ;;  %vm506_vm6 = vcmask 458112   ;;  %vm513_vm7 = vcmask 523712   ;;  %vm520_vm8 = vcmask 589312  }
   0xb   :  { %v34_v15 = vld [vmem:[%s1012_s0 + $0x60] sm:$0xff]  ;;  %v35_v17 = vld [vmem:[%s1012_s0 + $0x68] sm:$0xff]  ;;  %v28_v18 = vld [vmem:[%s1012_s0 + $0x30] sm:$0xff]  ;;  %vm527_vm9 = vcmask 654912   ;;  %vm534_vm10 = vcmask 720512   ;;  %vm541_vm11 = vcmask 786112  }
   0xc   :  { %650 = vmatmul.mubr.msk.f32.vlgmr.msra.gmra.mrb[0].mxu0 %vm49_vm0, %v23_v8  ;;  %v36_v19 = vld [vmem:[%s1012_s0 + $0x70] sm:$0xff]  ;;  %v29_v20 = vld [vmem:[%s1012_s0 + $0x38] sm:$0xff]  ;;  %v884_v22 = vld [vmem:[%s1014_s2] ss:$0 sm:$0xff]  ;;  %vm548_vm12 = vcmask 851712   ;;  %vm555_vm13 = vcmask 917312  }
   0xd   :  { %662 = vmatmul.mubr.msk.f32.vlgmr.msra.gmra.mrb[0].mxu1 %vm49_vm0, %v31_v9  ;;  %652 = vmatprep.mubr.msk.f32.mxu0 %vm49_vm0, %v24_v10  ;;  %v37_v21 = vld [vmem:[%s1012_s0 + $0x78] sm:$0xff]  ;;  %v893_v31 = vld [vmem:[%s1015_s3] ss:$0 sm:$0xff]  ;;  %vm562_vm14 = vcmask 982912   ;;  %vm569_vm15 = vcmask 1048512  }
   0xe   :  { %664 = vmatprep.mubr.msk.f32.mxu1 %vm49_vm0, %v32_v11 }
  0x10   :  { %653 = vmatmul.mubr.msk.f32.gmra.mrb[2].mxu0 %vm49_vm0, %v25_v12 }
  0x11   :  { %665 = vmatmul.mubr.msk.f32.gmra.mrb[2].mxu1 %vm49_vm0, %v33_v13  ;;  %655 = vmatprep.mubr.msk.f32.mxu0 %vm49_vm0, %v26_v14 }
  0x12   :  { %667 = vmatprep.mubr.msk.f32.mxu1 %vm49_vm0, %v34_v15 }
  0x14   :  { %656 = vmatmul.mubr.msk.f32.gmra.mrb[4].mxu0 %vm49_vm0, %v27_v16 }
  0x15   :  { %668 = vmatmul.mubr.msk.f32.gmra.mrb[4].mxu1 %vm49_vm0, %v35_v17  ;;  %658 = vmatprep.mubr.msk.f32.mxu0 %vm49_vm0, %v28_v18 }
  0x16   :  { %670 = vmatprep.mubr.msk.f32.mxu1 %vm49_vm0, %v36_v19 }
  0x18   :  { %659 = vmatmul.mubr.msk.f32.gmra.mrb[6].mxu0 %vm49_vm0, %v29_v20 }
  0x19   :  { %671 = vmatmul.mubr.msk.f32.gmra.mrb[6].mxu1 %vm49_vm0, %v37_v21 }
  0xdf   :  { %v651_v23 = vpop.f32.mrb[0].mxu0 }
  0xe0   :  { %v663_v24 = vpop.f32.mrb[0].mxu1  ;;  %v170_v25 = vadd.f32 %v651_v23, %v884_v22  ;;  %v164_v27 = vpop.f32.mrb[1].mxu0 }
  0xe1   :  { %v210_v26 = vadd.f32 %v663_v24, %v884_v22  ;;  %v204_v28 = vpop.f32.mrb[1].mxu1  ;;  %v165_v29 = vadd.f32 %v884_v22, %v164_v27 }
  0xe2   :  { %v205_v30 = vadd.f32 %v884_v22, %v204_v28  ;;  %v244_v32 = vmax.f32 %v170_v25, 0.0 }
  0xe3   :  { %v252_v33 = vmax.f32 %v210_v26, 0.0  ;;  %v243_v34 = vmax.f32 %v165_v29, 0.0  ;;  %v654_v35 = vpop.f32.mrb[2].mxu0 }
  0xe4   :  { %v666_v36 = vpop.f32.mrb[2].mxu1  ;;  %v180_v37 = vadd.f32 %v654_v35, %v884_v22  ;;  %v174_v38 = vpop.f32.mrb[3].mxu0  ;;  %v267_v41 = vmul.f32 %v893_v31, %v244_v32  ;;  %v251_v43 = vmax.f32 %v205_v30, 0.0 }
  0xe5   :  { %v275_v39 = vmul.f32 %v893_v31, %v252_v33  ;;  %v220_v40 = vadd.f32 %v666_v36, %v884_v22  ;;  %v214_v42 = vpop.f32.mrb[3].mxu1  ;;  %v175_v44 = vadd.f32 %v884_v22, %v174_v38  ;;  %v266_v46 = vmul.f32 %v893_v31, %v243_v34 }
  0xe6   :  { %v215_v45 = vadd.f32 %v884_v22, %v214_v42  ;;  %v246_v47 = vmax.f32 %v180_v37, 0.0  ;;  %v285_v50 = vsel %vm49_vm0, %v267_v41, 0.0  ;;  %v274_v59 = vmul.f32 %v893_v31, %v251_v43 }
  0xe7   :  { %v309_v48 = vsel %vm49_vm0, %v275_v39, 0.0  ;;  %v254_v49 = vmax.f32 %v220_v40, 0.0  ;;  %286 = vadd.xlane.f32.xlu0 %v285_v50  ;;  %v657_v51 = vpop.f32.mrb[4].mxu0  ;;  %v245_v60 = vmax.f32 %v175_v44, 0.0  ;;  %v282_v63 = vsel %vm49_vm0, %v266_v46, 0.0 }
  0xe8   :  { %310 = vadd.xlane.f32.xlu1 %v309_v48  ;;  %v669_v52 = vpop.f32.mrb[4].mxu1  ;;  %v269_v53 = vmul.f32 %v893_v31, %v246_v47  ;;  %v190_v54 = vadd.f32 %v657_v51, %v884_v22  ;;  %v184_v55 = vpop.f32.mrb[5].mxu0  ;;  %v253_v61 = vmax.f32 %v215_v45, 0.0  ;;  %v306_v9 = vsel %vm49_vm0, %v274_v59, 0.0 }
  0xe9   :  { %v277_v56 = vmul.f32 %v893_v31, %v254_v49  ;;  %v224_v57 = vpop.f32.mrb[5].mxu1  ;;  %v185_v58 = vadd.f32 %v884_v22, %v184_v55  ;;  %v268_v10 = vmul.f32 %v893_v31, %v245_v60  ;;  %v230_v12 = vadd.f32 %v669_v52, %v884_v22 }
  0xea   :  { %v291_v62 = vsel %vm49_vm0, %v269_v53, 0.0  ;;  %v248_v2 = vmax.f32 %v190_v54, 0.0  ;;  %v276_v11 = vmul.f32 %v893_v31, %v253_v61  ;;  %v225_v13 = vadd.f32 %v884_v22, %v224_v57 }
  0xeb   :  { %283 = vadd.xlane.f32.xlu0 %v282_v63  ;;  %v660_v0 = vpop.f32.mrb[6].mxu0  ;;  %v247_v3 = vmax.f32 %v185_v58, 0.0  ;;  %v315_v4 = vsel %vm49_vm0, %v277_v56, 0.0  ;;  %v288_v18 = vsel %vm49_vm0, %v268_v10, 0.0  ;;  %v256_v20 = vmax.f32 %v230_v12, 0.0 }
  0xec   :  { %292 = vadd.xlane.f32.xlu1 %v291_v62  ;;  %v672_v1 = vpop.f32.mrb[6].mxu1  ;;  %v200_v5 = vadd.f32 %v660_v0, %v884_v22  ;;  %v194_v6 = vpop.f32.mrb[7].mxu0  ;;  %v271_v16 = vmul.f32 %v893_v31, %v248_v2  ;;  %v312_v19 = vsel %vm49_vm0, %v276_v11, 0.0  ;;  %v255_v21 = vmax.f32 %v225_v13, 0.0 }
  0xed   :  { %v234_v7 = vpop.f32.mrb[7].mxu1  ;;  %v195_v8 = vadd.f32 %v884_v22, %v194_v6  ;;  %v270_v17 = vmul.f32 %v893_v31, %v247_v3  ;;  %v240_v23 = vadd.f32 %v672_v1, %v884_v22  ;;  %v279_v29 = vmul.f32 %v893_v31, %v256_v20 }
  0xee   :  { %v250_v14 = vmax.f32 %v200_v5, 0.0  ;;  %v235_v24 = vadd.f32 %v884_v22, %v234_v7  ;;  %v297_v25 = vsel %vm49_vm0, %v271_v16, 0.0  ;;  %v278_v30 = vmul.f32 %v893_v31, %v255_v21 }
  0xef   :  { %307 = vadd.xlane.f32.xlu0 %v306_v9  ;;  %v249_v15 = vmax.f32 %v195_v8, 0.0  ;;  %v294_v26 = vsel %vm49_vm0, %v270_v17, 0.0  ;;  %v258_v32 = vmax.f32 %v240_v23, 0.0  ;;  %v321_v35 = vsel %vm49_vm0, %v279_v29, 0.0 }
  0xf0   :  { %316 = vadd.xlane.f32.xlu1 %v315_v4  ;;  %v273_v27 = vmul.f32 %v893_v31, %v250_v14  ;;  %v257_v33 = vmax.f32 %v235_v24, 0.0  ;;  %v318_v36 = vsel %vm49_vm0, %v278_v30, 0.0  ;;  %v942_v41 = vstv %s1016_s4  ;;  %s774_s4 = smov [#allocation3]  }
  0xf1   :  { %v272_v28 = vmul.f32 %v893_v31, %v249_v15  ;;  %v281_v37 = vmul.f32 %v893_v31, %v258_v32  ;;  %v460_v24 = vlaneseq  ;;  %s579_s9 = sshll.u32 %s774_s4, 4  ;;  %s580_s9 = int_to_ptr.vmem [resolvable:$true] %s579_s9 }
  0xf2   :  { %v303_v34 = vsel %vm49_vm0, %v273_v27, 0.0  ;;  %v280_v38 = vmul.f32 %v893_v31, %v257_v33  ;;  %s750_s10 = scalar_lea.vmem %s580_s9, 16  ;;  %s754_s11 = scalar_lea.vmem %s580_s9, 32 }
  0xf3   :  { %313 = vadd.xlane.f32.xlu0 %v312_v19  ;;  %v300_v22 = vsel %vm49_vm0, %v272_v28, 0.0  ;;  %v327_v39 = vsel %vm49_vm0, %v281_v37, 0.0  ;;  %p751_p0 = scmp.ne.s32.totalorder %s580_s9, %s750_s10  ;;  %p755_p1 = scmp.lt.s32.totalorder %s580_s9, %s580_s9 }
  0xf4   :  { %289 = vadd.xlane.f32.xlu1 %v288_v18  ;;  %v324_v40 = vsel %vm49_vm0, %v280_v38, 0.0  ;;  %p756_p2 = scmp.lt.s32.totalorder %s754_s11, %s750_s10 }
  0xf6   :  { %p757_p3 = por %p756_p2, %p755_p1 }
  0xf7   :  { %295 = vadd.xlane.f32.xlu0 %v294_v26 }
  0xf8   :  { %298 = vadd.xlane.f32.xlu1 %v297_v25  ;;  %p758_p4 = pnand %p757_p3, %p751_p0 }
  0xfb   :  { %301 = vadd.xlane.f32.xlu0 %v300_v22 }
  0xfc   :  { %304 = vadd.xlane.f32.xlu1 %v303_v34 }
  0xff   :  { %319 = vadd.xlane.f32.xlu0 %v318_v36  ;;  %v960_v36 = vand.u32 127, %v460_v24 }
 0x100   :  { %322 = vadd.xlane.f32.xlu1 %v321_v35 }
 0x103   :  { %325 = vadd.xlane.f32.xlu0 %v324_v40 }
 0x104   :  { %328 = vadd.xlane.f32.xlu1 %v327_v39 }
 0x174   :  { %v287_v43 = vpop.xlane.xlu0 %286 }
 0x175   :  { %v311_v42 = vpop.xlane.xlu1 %310  ;;  %v333_v44 = vadd.f32 %v942_v41, %v287_v43 }
 0x176   :  { %v341_v52 = vadd.f32 %v942_v41, %v311_v42 }
 0x177   :  { %v606_v45 = vmul.f32 -1.442695, %v333_v44  ;;  %v473_v44 = vadd.s32 4294967280, %v960_v36 }
 0x178   :  { %v284_v31 = vpop.xlane.xlu0 %283  ;;  %v614_v59 = vmul.f32 -1.442695, %v341_v52 }
 0x179   :  { %v293_v46 = vpop.xlane.xlu1 %292  ;;  %v332_v47 = vadd.f32 %v942_v41, %v284_v31  ;;  %686 = vpow2.f32 %v606_v45 }
 0x17a   :  { %v335_v49 = vadd.f32 %v942_v41, %v293_v46  ;;  %v963_v46 = vshrl.u32 %v460_v24, 7 }
 0x17b   :  { %v605_v48 = vmul.f32 -1.442695, %v332_v47 }
 0x17c   :  { %v308_v51 = vpop.xlane.xlu0 %307  ;;  %v608_v53 = vmul.f32 -1.442695, %v335_v49  ;;  %v464_v52 = vsub.s32 %v960_v36, %v963_v46 }
 0x17d   :  { %v317_v50 = vpop.xlane.xlu1 %316  ;;  %688 = vpow2.f32 %v605_v48  ;;  %v340_v58 = vadd.f32 %v942_v41, %v308_v51  ;;  %v480_v48 = vadd.s32 4294967272, %v960_v36 }
 0x17e   :  { %v343_v54 = vadd.f32 %v942_v41, %v317_v50  ;;  %690 = vpow2.f32 %v608_v53 }
 0x17f   :  { %v613_v3 = vmul.f32 -1.442695, %v340_v58 }
 0x180   :  { %v314_v56 = vpop.xlane.xlu0 %313  ;;  %v616_v62 = vmul.f32 -1.442695, %v343_v54 }
 0x181   :  { %v290_v55 = vpop.xlane.xlu1 %289  ;;  %v342_v4 = vadd.f32 %v942_v41, %v314_v56 }
 0x182   :  { %v334_v57 = vadd.f32 %v942_v41, %v290_v55  ;;  %v476_v55 = vsub.s32 %v473_v44, %v963_v46 }
 0x183   :  { %v687_v61 = vpop.eup %686  ;;  %v615_v13 = vmul.f32 -1.442695, %v342_v4 }
 0x184   :  { %v607_v60 = vmul.f32 -1.442695, %v334_v57  ;;  %v296_v0 = vpop.xlane.xlu0 %295  ;;  %v397_v5 = vadd.f32 1.0, %v687_v61  ;;  %v971_v57 = vadd.s32 4294967224, %v960_v36 }
 0x185   :  { %v299_v63 = vpop.xlane.xlu1 %298  ;;  %v336_v2 = vadd.f32 %v942_v41, %v296_v0  ;;  %v487_v0 = vadd.s32 4294967264, %v960_v36 }
 0x186   :  { %692 = vpow2.f32 %v607_v60  ;;  %v337_v1 = vadd.f32 %v942_v41, %v299_v63 }
 0x187   :  { %694 = vpow2.f32 %v614_v59  ;;  %v689_v7 = vpop.eup %688  ;;  %v609_v8 = vmul.f32 -1.442695, %v336_v2 }
 0x188   :  { %v610_v6 = vmul.f32 -1.442695, %v337_v1  ;;  %696 = vpow2.f32 %v616_v62  ;;  %v302_v10 = vpop.xlane.xlu0 %301  ;;  %v396_v14 = vadd.f32 1.0, %v689_v7  ;;  %v691_v21 = vpop.eup %690  ;;  %v483_v62 = vsub.s32 %v480_v48, %v963_v46 }
 0x189   :  { %v305_v9 = vpop.xlane.xlu1 %304  ;;  %v338_v12 = vadd.f32 %v942_v41, %v302_v10  ;;  %v399_v32 = vadd.f32 1.0, %v691_v21 }
 0x18a   :  { %698 = vpow2.f32 %v610_v6  ;;  %v339_v11 = vadd.f32 %v942_v41, %v305_v9  ;;  %v508_v9 = vadd.s32 4294967240, %v960_v36 }
 0x18b   :  { %700 = vpow2.f32 %v613_v3  ;;  %v611_v16 = vmul.f32 -1.442695, %v338_v12  ;;  %v494_v3 = vadd.s32 4294967256, %v960_v36  ;;  %v490_v12 = vsub.s32 %v487_v0, %v963_v46 }
 0x18c   :  { %702 = vrcp.f32 %v397_v5  ;;  %v612_v15 = vmul.f32 -1.442695, %v339_v11  ;;  %v320_v18 = vpop.xlane.xlu0 %319  ;;  %v515_v11 = vadd.s32 4294967232, %v960_v36  ;;  %v511_v24 = vsub.s32 %v508_v9, %v963_v46 }
 0x18d   :  { %704 = vpow2.f32 %v609_v8  ;;  %v323_v17 = vpop.xlane.xlu1 %322  ;;  %v344_v20 = vadd.f32 %v942_v41, %v320_v18 }
 0x18e   :  { %706 = vpow2.f32 %v612_v15  ;;  %v345_v19 = vadd.f32 %v942_v41, %v323_v17  ;;  %v536_v17 = vadd.s32 4294967208, %v960_v36 }
 0x18f   :  { %708 = vpow2.f32 %v615_v13  ;;  %v617_v26 = vmul.f32 -1.442695, %v344_v20  ;;  %v501_v13 = vadd.s32 4294967248, %v960_v36 }
 0x190   :  { %v693_v23 = vpop.eup %692  ;;  %710 = vrcp.f32 %v396_v14  ;;  %v618_v25 = vmul.f32 -1.442695, %v345_v19  ;;  %v326_v29 = vpop.xlane.xlu0 %325  ;;  %v539_v48 = vsub.s32 %v536_v17, %v963_v46 }
 0x191   :  { %v398_v27 = vadd.f32 1.0, %v693_v23  ;;  %712 = vpow2.f32 %v611_v16  ;;  %v329_v28 = vpop.xlane.xlu1 %328  ;;  %v695_v30 = vpop.eup %694  ;;  %v346_v34 = vadd.f32 %v942_v41, %v326_v29  ;;  %v497_v16 = vsub.s32 %v494_v3, %v963_v46 }
 0x192   :  { %714 = vpow2.f32 %v618_v25  ;;  %v347_v33 = vadd.f32 %v942_v41, %v329_v28  ;;  %v697_v22 = vpop.eup %696  ;;  %v466_v41 = vadd.s32 4294967288, %v960_v36  ;;  %v405_v54 = vadd.f32 1.0, %v695_v30 }
 0x193   :  { %716 = vrcp.f32 %v398_v27  ;;  %v619_v40 = vmul.f32 -1.442695, %v346_v34  ;;  %v407_v63 = vadd.f32 1.0, %v697_v22  ;;  %v529_v27 = vadd.s32 4294967216, %v960_v36 }
 0x194   :  { %v699_v35 = vpop.eup %698  ;;  %718 = vpow2.f32 %v617_v26  ;;  %v620_v37 = vmul.f32 -1.442695, %v347_v33  ;;  %v469_v58 = vsub.s32 %v466_v41, %v963_v46  ;;  %v504_v29 = vsub.s32 %v501_v13, %v963_v46 }
 0x195   :  { %v701_v38 = vpop.eup %700  ;;  %v401_v39 = vadd.f32 1.0, %v699_v35  ;;  %720 = vrcp.f32 %v399_v32  ;;  %v543_v33 = vadd.s32 4294967200, %v960_v36  ;;  %v518_v22 = vsub.s32 %v515_v11, %v963_v46 }
 0x196   :  { %v703_v42 = vpop.eup %702  ;;  %v404_v49 = vadd.f32 1.0, %v701_v38  ;;  %v532_v44 = vsub.s32 %v529_v27, %v963_v46  ;;  %v557_v41 = vadd.s32 4294967184, %v960_v36 }
 0x197   :  { %v705_v43 = vpop.eup %704  ;;  %722 = vrcp.f32 %v401_v39  ;;  %v470_v8 = vrot.slane %v703_v42, %v469_v58  ;;  %v525_v39 = vsub.s32 %v971_v57, %v963_v46  ;;  %v564_v42 = vadd.s32 4294967176, %v960_v36 }
 0x198   :  { %v707_v45 = vpop.eup %706  ;;  %v400_v31 = vadd.f32 1.0, %v705_v43  ;;  %724 = vpow2.f32 %v620_v37  ;;  %v550_v37 = vadd.s32 4294967192, %v960_v36 }
 0x199   :  { %v709_v47 = vpop.eup %708  ;;  %v403_v50 = vadd.f32 1.0, %v707_v45  ;;  %726 = vpow2.f32 %v619_v40  ;;  %v567_v57 = vsub.s32 %v564_v42, %v963_v46 }
 0x19a   :  { %v711_v51 = vpop.eup %710  ;;  %728 = vrcp.f32 %v400_v31  ;;  %v406_v59 = vadd.f32 1.0, %v709_v47 }
 0x19b   :  { %v713_v53 = vpop.eup %712  ;;  %730 = vrcp.f32 %v403_v50  ;;  %v465_v2 = vrot.slane %v711_v51, %v464_v52 }
 0x19c   :  { %v715_v56 = vpop.eup %714  ;;  %v402_v60 = vadd.f32 1.0, %v713_v53  ;;  %732 = vrcp.f32 %v404_v49  ;;  %v546_v49 = vsub.s32 %v543_v33, %v963_v46  ;;  %v553_v53 = vsub.s32 %v550_v37, %v963_v46 }
 0x19d   :  { %v717_v61 = vpop.eup %716  ;;  %v409_v5 = vadd.f32 1.0, %v715_v56  ;;  %v472_v15 = vsel %vm471_vm1, %v470_v8, %v465_v2 }
 0x19e   :  { %v719_v1 = vpop.eup %718  ;;  %734 = vrcp.f32 %v402_v60  ;;  %v477_v4 = vrot.slane %v717_v61, %v476_v55  ;;  %v560_v60 = vsub.s32 %v557_v41, %v963_v46 }
 0x19f   :  { %736 = vrcp.f32 %v405_v54  ;;  %v408_v6 = vadd.f32 1.0, %v719_v1  ;;  %v721_v7 = vpop.eup %720 }
 0x1a0   :  { %738 = vrcp.f32 %v406_v59  ;;  %v479_v19 = vsel %vm478_vm2, %v477_v4, %v472_v15  ;;  %v484_v23 = vrot.slane %v721_v7, %v483_v62 }
 0x1a1   :  { %v723_v10 = vpop.eup %722  ;;  %740 = vrcp.f32 %v407_v63 }
 0x1a2   :  { %v725_v14 = vpop.eup %724  ;;  %742 = vrcp.f32 %v408_v6  ;;  %v498_v30 = vrot.slane %v723_v10, %v497_v16  ;;  %v486_v32 = vsel %vm485_vm3, %v484_v23, %v479_v19 }
 0x1a3   :  { %v727_v18 = vpop.eup %726  ;;  %744 = vrcp.f32 %v409_v5  ;;  %v411_v20 = vadd.f32 1.0, %v725_v14 }
 0x1a4   :  { %v729_v21 = vpop.eup %728  ;;  %v410_v25 = vadd.f32 1.0, %v727_v18 }
 0x1a5   :  { %v731_v26 = vpop.eup %730  ;;  %v491_v28 = vrot.slane %v729_v21, %v490_v12  ;;  %746 = vrcp.f32 %v411_v20 }
 0x1a6   :  { %748 = vrcp.f32 %v410_v25  ;;  %v733_v34 = vpop.eup %732  ;;  %v512_v40 = vrot.slane %v731_v26, %v511_v24 }
 0x1a7   :  { %v493_v35 = vsel %vm492_vm4, %v491_v28, %v486_v32  ;;  %v519_v51 = vrot.slane %v733_v34, %v518_v22 }
 0x1a8   :  { %v735_v38 = vpop.eup %734  ;;  %v500_v47 = vsel %vm499_vm5, %v498_v30, %v493_v35 }
 0x1a9   :  { %v737_v43 = vpop.eup %736  ;;  %v505_v45 = vrot.slane %v735_v38, %v504_v29 }
 0x1aa   :  { %v739_v31 = vpop.eup %738  ;;  %v526_v55 = vrot.slane %v737_v43, %v525_v39 }
 0x1ab   :  { %v741_v50 = vpop.eup %740  ;;  %v507_v52 = vsel %vm506_vm6, %v505_v45, %v500_v47  ;;  %v533_v58 = vrot.slane %v739_v31, %v532_v44 }
 0x1ac   :  { %v743_v54 = vpop.eup %742  ;;  %v514_v56 = vsel %vm513_vm7, %v512_v40, %v507_v52  ;;  %v540_v62 = vrot.slane %v741_v50, %v539_v48 }
 0x1ad   :  { %v745_v36 = vpop.eup %744  ;;  %v521_v59 = vsel %vm520_vm8, %v519_v51, %v514_v56  ;;  %v547_v1 = vrot.slane %v743_v54, %v546_v49 }
 0x1ae   :  { %v528_v61 = vsel %vm527_vm9, %v526_v55, %v521_v59  ;;  %v554_v4 = vrot.slane %v745_v36, %v553_v53 }
 0x1af   :  { %v747_v63 = vpop.eup %746  ;;  %v535_v0 = vsel %vm534_vm10, %v533_v58, %v528_v61 }
 0x1b0   :  { %v749_v2 = vpop.eup %748  ;;  %v542_v3 = vsel %vm541_vm11, %v540_v62, %v535_v0  ;;  %v568_v5 = vrot.slane %v747_v63, %v567_v57 }
 0x1b1   :  { %v549_v6 = vsel %vm548_vm12, %v547_v1, %v542_v3  ;;  %v561_v7 = vrot.slane %v749_v2, %v560_v60 }
 0x1b2   :  { %v556_v8 = vsel %vm555_vm13, %v554_v4, %v549_v6 }
 0x1b3   :  { %v563_v9 = vsel %vm562_vm14, %v561_v7, %v556_v8 }
 0x1b4   :  { %v570_v46 = vsel %vm569_vm15, %v568_v5, %v563_v9 }
 0x1b5   :  { %572 = vst [vmem:[#allocation3] sm:$0x1] %v570_v46 }
 0x1b6   :  { %761 = shalt.err (!%p758_p4)
}
 0x1b7   :  { %s762_s14 = scalar_lea.hbm %s1017_s5, 16 }
 0x1b8   :  { %p763_p5 = scmp.ne.s32.totalorder %s1017_s5, %s762_s14  ;;  %p766_p6 = scmp.lt.u32.totalorder %s762_s14, %s1017_s5 }
 0x1ba   :  { %p768_p7 = pnand %p766_p6, %p763_p5 }
 0x1bc   :  { %771 = shalt.err (!%p768_p7)
}
 0x1bd   :  { %582 = dma.vmem_to_hbm [thread:$0]  %s580_s9, 16, %s1017_s5, [#allocation4]  }
 0x1be   :  { %772 = dma.done.wait [#allocation4], 16  }
 0x1bf   :  { %773 = vsyncadd [#allocation4], 4294967280 }
 0x1c0   :  { %586 = vsyncpa [#allocation4], 1 }

</bundles_post_ra>
